<compile_context>
chip_gen: v7x
topology: tpu7x:2x2x1
jax: 0.10.0
libtpu: 0.0.40
codegen_flags: <defaults>
</compile_context>

<pallas_src>
import functools

import jax
import jax.numpy as jnp
from jax.experimental import pallas as pl
from jax.experimental.pallas import tpu as pltpu


MAX_TILE_N = 1024   # rows per grid step (largest tile; trivially fits VMEM here)
LANE = 128          # lane width -> padded width of the final logits


# ----------------------------------------------------------------------------
# Fused MLP kernel: in_layer -> nblocks x (linear+bias+ReLU) -> out_layer
# ----------------------------------------------------------------------------
def _fog_mlp_kernel(x_ref, w_in_ref, b_in_ref, blk_w_ref, blk_b_ref,
                    w_out_ref, b_out_ref, o_ref, *, nblocks: int):
    # in_layer: plain linear
    h = jnp.dot(x_ref[...], w_in_ref[...], preferred_element_type=jnp.float32)
    h = h + b_in_ref[...]

    # blocks: Linear (BN folded in) -> ReLU -> Dropout(identity at inference).
    # nblocks is a compile-time constant -> static unrolled loop, static slices.
    for i in range(nblocks):
        h = jnp.dot(h, blk_w_ref[i], preferred_element_type=jnp.float32)
        h = jnp.maximum(h + blk_b_ref[i], 0.0)

    # out_layer: plain linear, padded to a full 128-lane width so the store is
    # an unmasked full-width vst.
    y = jnp.dot(h, w_out_ref[...], preferred_element_type=jnp.float32)
    o_ref[...] = (y + b_out_ref[...]).astype(o_ref.dtype)


# ----------------------------------------------------------------------------
# Parameter construction (synthetic, deterministic; matches PyTorch shapes)
# ----------------------------------------------------------------------------
def init_params(cfg, key):
    in_features = cfg["window_size"] * 3
    dim = cfg["eventsep_model_hidden"]
    nblocks = cfg["eventsep_model_nblocks"]
    eps = 1e-5

    def linear(key, fan_in, fan_out):
        kw, kb = jax.random.split(key)
        bound = 1.0 / jnp.sqrt(fan_in)
        # stored as (in, out) == PyTorch weight.T
        w = jax.random.uniform(kw, (fan_in, fan_out), jnp.float32, -bound, bound)
        b = jax.random.uniform(kb, (1, fan_out), jnp.float32, -bound, bound)
        return w, b

    def batchnorm(key, features):
        kg, kb, km, kv = jax.random.split(key, 4)
        gamma = 1.0 + 0.1 * jax.random.normal(kg, (1, features), jnp.float32)
        beta = 0.1 * jax.random.normal(kb, (1, features), jnp.float32)
        running_mean = 0.1 * jax.random.normal(km, (1, features), jnp.float32)
        running_var = jnp.abs(1.0 + 0.1 * jax.random.normal(kv, (1, features),
                                                            jnp.float32))
        # fold into affine: y = x * scale + shift
        scale = gamma / jnp.sqrt(running_var + eps)
        shift = beta - running_mean * scale
        return scale, shift

    keys = jax.random.split(key, 2 + 2 * nblocks)
    params = {}
    params["in_layer"] = linear(keys[0], in_features, dim)
    params["blocks"] = []
    for i in range(nblocks):
        lw, lb = linear(keys[1 + 2 * i], dim, dim)
        sc, sh = batchnorm(keys[2 + 2 * i], dim)
        params["blocks"].append((lw, lb, sc, sh))
    params["out_layer"] = linear(keys[1 + 2 * nblocks], dim, 2)
    return params


# ----------------------------------------------------------------------------
# Forward pass (single fused pallas_call)
# ----------------------------------------------------------------------------
def _round_up(a, m):
    return ((a + m - 1) // m) * m


def fog_event_seperator_forward(cfg, params, x):
    """x: any shape reshapeable to (-1, window_size*3); returns (N, 2) logits."""
    in_features = cfg["window_size"] * 3
    dim = cfg["eventsep_model_hidden"]
    nblocks = cfg["eventsep_model_nblocks"]

    x = jnp.reshape(x, (-1, in_features)).astype(jnp.float32)
    n = x.shape[0]

    # ---- fold BatchNorm into the block linears (offline, per forward trace) ----
    w_in, b_in = params["in_layer"]
    blk_w_list, blk_b_list = [], []
    for (w, b, sc, sh) in params["blocks"]:
        blk_w_list.append(w * sc)          # scale output columns of (in, out)
        blk_b_list.append(b * sc + sh)
    nblk_eff = max(nblocks, 1)             # keep a dummy slot if nblocks == 0
    if nblocks > 0:
        blk_w = jnp.stack(blk_w_list)                       # (nblocks, dim, dim)
        blk_b = jnp.stack(blk_b_list)                       # (nblocks, 1, dim)
    else:
        blk_w = jnp.zeros((1, dim, dim), jnp.float32)
        blk_b = jnp.zeros((1, 1, dim), jnp.float32)

    # ---- lane-dense output: pad out_layer to 128 columns, slice afterwards ----
    w_out, b_out = params["out_layer"]
    out_dim = w_out.shape[1]
    out_pad = max(LANE, _round_up(out_dim, LANE))
    w_out_p = jnp.zeros((dim, out_pad), jnp.float32).at[:, :out_dim].set(w_out)
    b_out_p = jnp.zeros((1, out_pad), jnp.float32).at[:, :out_dim].set(b_out)

    # ---- batch tiling: biggest tile (<= MAX_TILE_N) covering the batch ----
    # Per-grid-step overhead is ~0.35 us, so larger tiles amortize better; at
    # these dims even 1024-row tiles stay far below the scoped-VMEM limit.
    n_min = _round_up(max(n, 1), 8)
    tile_n = min(MAX_TILE_N, n_min)
    n_pad = _round_up(max(n, 1), tile_n)
    if n_pad != n:
        x = jnp.pad(x, ((0, n_pad - n), (0, 0)))

    grid = (n_pad // tile_n,)
    kernel = functools.partial(_fog_mlp_kernel, nblocks=nblocks)

    out = pl.pallas_call(
        kernel,
        out_shape=jax.ShapeDtypeStruct((n_pad, out_pad), jnp.float32),
        grid=grid,
        in_specs=[
            pl.BlockSpec((tile_n, in_features), lambda i: (i, 0)),     # x tile
            pl.BlockSpec((in_features, dim), lambda i: (0, 0)),        # w_in (resident)
            pl.BlockSpec((1, dim), lambda i: (0, 0)),                  # b_in
            pl.BlockSpec((nblk_eff, dim, dim), lambda i: (0, 0, 0)),   # block weights
            pl.BlockSpec((nblk_eff, 1, dim), lambda i: (0, 0, 0)),     # block biases
            pl.BlockSpec((dim, out_pad), lambda i: (0, 0)),            # w_out (padded)
            pl.BlockSpec((1, out_pad), lambda i: (0, 0)),              # b_out (padded)
        ],
        out_specs=pl.BlockSpec((tile_n, out_pad), lambda i: (i, 0)),
        compiler_params=pltpu.CompilerParams(
            dimension_semantics=("parallel",),   # shard batch tiles across TCs
        ),
    )(x, w_in, b_in, blk_w, blk_b, w_out_p, b_out_p)

    return out[:n, :out_dim]


# ----------------------------------------------------------------------------
# Pure-JAX reference for sanity checking
# ----------------------------------------------------------------------------
def reference_forward(cfg, params, x):
    in_features = cfg["window_size"] * 3
    x = jnp.reshape(x, (-1, in_features)).astype(jnp.float32)
    w, b = params["in_layer"]
    x = x @ w + b
    for (w, b, sc, sh) in params["blocks"]:
        x = (x @ w + b) * sc + sh
        x = jnp.maximum(x, 0.0)
    w, b = params["out_layer"]
    return x @ w + b


if __name__ == "__main__":
    cfg = {
        "window_size": 8,                 # -> in_features = 24
        "eventsep_model_hidden": 32,
        "eventsep_model_nblocks": 2,
        "eventsep_model_dropout": 0.1,    # identity at inference
    }

    key = jax.random.PRNGKey(0)
    kp, kx = jax.random.split(key)
    params = init_params(cfg, kp)

    # example input: (batch, window_size, 3) -> viewed as (batch, window_size*3)
    x = jax.random.normal(kx, (16, cfg["window_size"], 3), jnp.float32)

    out = fog_event_seperator_forward(cfg, params, x)
    out = jax.block_until_ready(out)

    ref = reference_forward(cfg, params, x)
    assert out.shape == (16, 2), out.shape
    assert jnp.allclose(out, ref, atol=1e-4, rtol=1e-4), "mismatch vs reference"

    print("KERNEL_OK")
</pallas_src>

<mosaic_0001>
module attributes {stable_mosaic.version = 11 : i64} {
  func.func @_fog_mlp_kernel(%arg0: i32, %arg1: memref<16x24xf32, #tpu.memory_space<vmem>>, %arg2: memref<24x32xf32, #tpu.memory_space<vmem>>, %arg3: memref<1x32xf32, #tpu.memory_space<vmem>>, %arg4: memref<2x32x32xf32, #tpu.memory_space<vmem>>, %arg5: memref<2x1x32xf32, #tpu.memory_space<vmem>>, %arg6: memref<32x128xf32, #tpu.memory_space<vmem>>, %arg7: memref<1x128xf32, #tpu.memory_space<vmem>>, %arg8: memref<16x128xf32, #tpu.memory_space<vmem>>) attributes {dimension_semantics = [#tpu.dimension_semantics<parallel>], iteration_bounds = array<i64: 1>, scalar_prefetch = 0 : i64, scratch_operands = 0 : i64, tpu.core_type = #tpu.core_type<tc>, window_params = [{transform_indices = @transform_0, window_bounds = array<i64: 16, 24>}, {pipeline_mode = #tpu.pipeline_mode<synchronous>, transform_indices = @transform_1, window_bounds = array<i64: 24, 32>}, {pipeline_mode = #tpu.pipeline_mode<synchronous>, transform_indices = @transform_2, window_bounds = array<i64: 1, 32>}, {pipeline_mode = #tpu.pipeline_mode<synchronous>, transform_indices = @transform_3, window_bounds = array<i64: 2, 32, 32>}, {pipeline_mode = #tpu.pipeline_mode<synchronous>, transform_indices = @transform_4, window_bounds = array<i64: 2, 1, 32>}, {pipeline_mode = #tpu.pipeline_mode<synchronous>, transform_indices = @transform_5, window_bounds = array<i64: 32, 128>}, {pipeline_mode = #tpu.pipeline_mode<synchronous>, transform_indices = @transform_6, window_bounds = array<i64: 1, 128>}, {transform_indices = @transform_7, window_bounds = array<i64: 16, 128>}]} {
    %c0 = arith.constant 0 : index
    %c0_0 = arith.constant 0 : index
    %0 = vector.load %arg1[%c0, %c0_0] : memref<16x24xf32, #tpu.memory_space<vmem>>, vector<16x24xf32>
    %c0_1 = arith.constant 0 : index
    %c0_2 = arith.constant 0 : index
    %1 = vector.load %arg2[%c0_1, %c0_2] : memref<24x32xf32, #tpu.memory_space<vmem>>, vector<24x32xf32>
    %cst = arith.constant dense<0.000000e+00> : vector<16x32xf32>
    %2 = tpu.matmul %0, %1, %cst {dimension_numbers = #tpu.dot_dimension_numbers<[1], [0], [0], [1], [0, 0, 1, 1], [], []>} : vector<16x24xf32>, vector<24x32xf32>, vector<16x32xf32> -> vector<16x32xf32>
    %c0_3 = arith.constant 0 : index
    %c0_4 = arith.constant 0 : index
    %3 = vector.load %arg3[%c0_3, %c0_4] : memref<1x32xf32, #tpu.memory_space<vmem>>, vector<1x32xf32>
    %4 = vector.broadcast %3 : vector<1x32xf32> to vector<16x32xf32>
    %5 = arith.addf %2, %4 : vector<16x32xf32>
    %c0_5 = arith.constant 0 : index
    %c0_6 = arith.constant 0 : index
    %c0_7 = arith.constant 0 : index
    %6 = vector.load %arg4[%c0_5, %c0_6, %c0_7] : memref<2x32x32xf32, #tpu.memory_space<vmem>>, vector<1x32x32xf32>
    %7 = vector.shape_cast %6 : vector<1x32x32xf32> to vector<32x32xf32>
    %cst_8 = arith.constant dense<0.000000e+00> : vector<16x32xf32>
    %8 = tpu.matmul %5, %7, %cst_8 {dimension_numbers = #tpu.dot_dimension_numbers<[1], [0], [0], [1], [0, 0, 1, 1], [], []>} : vector<16x32xf32>, vector<32x32xf32>, vector<16x32xf32> -> vector<16x32xf32>
    %c0_9 = arith.constant 0 : index
    %c0_10 = arith.constant 0 : index
    %c0_11 = arith.constant 0 : index
    %9 = vector.load %arg5[%c0_9, %c0_10, %c0_11] : memref<2x1x32xf32, #tpu.memory_space<vmem>>, vector<1x1x32xf32>
    %10 = vector.shape_cast %9 : vector<1x1x32xf32> to vector<1x32xf32>
    %11 = vector.broadcast %10 : vector<1x32xf32> to vector<16x32xf32>
    %12 = arith.addf %8, %11 : vector<16x32xf32>
    %cst_12 = arith.constant 0.000000e+00 : f32
    %13 = vector.broadcast %cst_12 : f32 to vector<16x32xf32>
    %14 = arith.maximumf %12, %13 : vector<16x32xf32>
    %c1 = arith.constant 1 : index
    %c0_13 = arith.constant 0 : index
    %c0_14 = arith.constant 0 : index
    %15 = vector.load %arg4[%c1, %c0_13, %c0_14] : memref<2x32x32xf32, #tpu.memory_space<vmem>>, vector<1x32x32xf32>
    %16 = vector.shape_cast %15 : vector<1x32x32xf32> to vector<32x32xf32>
    %cst_15 = arith.constant dense<0.000000e+00> : vector<16x32xf32>
    %17 = tpu.matmul %14, %16, %cst_15 {dimension_numbers = #tpu.dot_dimension_numbers<[1], [0], [0], [1], [0, 0, 1, 1], [], []>} : vector<16x32xf32>, vector<32x32xf32>, vector<16x32xf32> -> vector<16x32xf32>
    %c1_16 = arith.constant 1 : index
    %c0_17 = arith.constant 0 : index
    %c0_18 = arith.constant 0 : index
    %18 = vector.load %arg5[%c1_16, %c0_17, %c0_18] : memref<2x1x32xf32, #tpu.memory_space<vmem>>, vector<1x1x32xf32>
    %19 = vector.shape_cast %18 : vector<1x1x32xf32> to vector<1x32xf32>
    %20 = vector.broadcast %19 : vector<1x32xf32> to vector<16x32xf32>
    %21 = arith.addf %17, %20 : vector<16x32xf32>
    %cst_19 = arith.constant 0.000000e+00 : f32
    %22 = vector.broadcast %cst_19 : f32 to vector<16x32xf32>
    %23 = arith.maximumf %21, %22 : vector<16x32xf32>
    %c0_20 = arith.constant 0 : index
    %c0_21 = arith.constant 0 : index
    %24 = vector.load %arg6[%c0_20, %c0_21] : memref<32x128xf32, #tpu.memory_space<vmem>>, vector<32x128xf32>
    %cst_22 = arith.constant dense<0.000000e+00> : vector<16x128xf32>
    %25 = tpu.matmul %23, %24, %cst_22 {dimension_numbers = #tpu.dot_dimension_numbers<[1], [0], [0], [1], [0, 0, 1, 1], [], []>} : vector<16x32xf32>, vector<32x128xf32>, vector<16x128xf32> -> vector<16x128xf32>
    %c0_23 = arith.constant 0 : index
    %c0_24 = arith.constant 0 : index
    %26 = vector.load %arg7[%c0_23, %c0_24] : memref<1x128xf32, #tpu.memory_space<vmem>>, vector<1x128xf32>
    %27 = vector.broadcast %26 : vector<1x128xf32> to vector<16x128xf32>
    %28 = arith.addf %25, %27 : vector<16x128xf32>
    %c0_25 = arith.constant 0 : index
    %c0_26 = arith.constant 0 : index
    %29 = vector.load %arg8[%c0_25, %c0_26] : memref<16x128xf32, #tpu.memory_space<vmem>>, vector<16x128xf32>
    tpu.vector_store %arg8[%c0_25, %c0_26], %28 {strides = array<i32>} : memref<16x128xf32, #tpu.memory_space<vmem>>, vector<16x128xf32>,
    return
  }
  func.func @transform_0(%arg0: i32) -> (i32, i32) {
    %c0_i32 = arith.constant 0 : i32
    %c0_i32_0 = arith.constant 0 : i32
    return %arg0, %c0_i32 : i32, i32
  }
  func.func @transform_1(%arg0: i32) -> (i32, i32) {
    %c0_i32 = arith.constant 0 : i32
    %c0_i32_0 = arith.constant 0 : i32
    %c0_i32_1 = arith.constant 0 : i32
    return %c0_i32, %c0_i32_0 : i32, i32
  }
  func.func @transform_2(%arg0: i32) -> (i32, i32) {
    %c0_i32 = arith.constant 0 : i32
    %c0_i32_0 = arith.constant 0 : i32
    %c0_i32_1 = arith.constant 0 : i32
    return %c0_i32, %c0_i32_0 : i32, i32
  }
  func.func @transform_3(%arg0: i32) -> (i32, i32, i32) {
    %c0_i32 = arith.constant 0 : i32
    %c0_i32_0 = arith.constant 0 : i32
    %c0_i32_1 = arith.constant 0 : i32
    %c0_i32_2 = arith.constant 0 : i32
    return %c0_i32, %c0_i32_0, %c0_i32_1 : i32, i32, i32
  }
  func.func @transform_4(%arg0: i32) -> (i32, i32, i32) {
    %c0_i32 = arith.constant 0 : i32
    %c0_i32_0 = arith.constant 0 : i32
    %c0_i32_1 = arith.constant 0 : i32
    %c0_i32_2 = arith.constant 0 : i32
    return %c0_i32, %c0_i32_0, %c0_i32_1 : i32, i32, i32
  }
  func.func @transform_5(%arg0: i32) -> (i32, i32) {
    %c0_i32 = arith.constant 0 : i32
    %c0_i32_0 = arith.constant 0 : i32
    %c0_i32_1 = arith.constant 0 : i32
    return %c0_i32, %c0_i32_0 : i32, i32
  }
  func.func @transform_6(%arg0: i32) -> (i32, i32) {
    %c0_i32 = arith.constant 0 : i32
    %c0_i32_0 = arith.constant 0 : i32
    %c0_i32_1 = arith.constant 0 : i32
    return %c0_i32, %c0_i32_0 : i32, i32
  }
  func.func @transform_7(%arg0: i32) -> (i32, i32) {
    %c0_i32 = arith.constant 0 : i32
    %c0_i32_0 = arith.constant 0 : i32
    return %arg0, %c0_i32 : i32, i32
  }
}

</mosaic_0001>

<bundles_post_ra>
// kernel: tpu_custom_call.1
= control target key start
LH: loop header
LB: loop body
LE: loop exit
PB: predicated region body
PF: predicated region fallthrough
CT: control target
= control target key end

     0   :  { %12 = vsyncpa [#allocation3], 0  ;;  %s867_s0 = inlined_call_operand.hbm [shape: f32[16,24], index: 0, kind: input, shape index: {}]   ;;  %s868_s1 = inlined_call_operand.hbm [shape: f32[24,32], index: 1, kind: input, shape index: {}]   ;;  %s869_s2 = inlined_call_operand.vmem [shape: f32[1,32], index: 2, kind: input, shape index: {}]   ;;  %s870_s3 = inlined_call_operand.hbm [shape: f32[2,32,32], index: 3, kind: input, shape index: {}]   ;;  %s871_s4 = inlined_call_operand.vmem [shape: f32[2,1,32], index: 4, kind: input, shape index: {}]   ;;  %s872_s5 = inlined_call_operand.hbm [shape: f32[32,128], index: 5, kind: input, shape index: {}]   ;;  %s873_s6 = inlined_call_operand.vmem [shape: f32[1,128], index: 6, kind: input, shape index: {}]   ;;  %s874_s7 = inlined_call_operand.hbm [shape: f32[16,128], index: 7, kind: output, shape index: {}]  }
   0x1   :  { %13 = vsyncpa [#allocation6], 0 }
   0x2   :  { %14 = vsyncpa [#allocation9], 0 }
   0x3   :  { %15 = vsyncpa [#allocation4], 0  ;;  %s711_s24 = smov [#allocation5]   ;;  %s712_s26 = smov [#allocation2]  }
   0x4   :  { %s33_s25 = sshll.u32 %s711_s24, 4  ;;  %s21_s27 = sshll.u32 %s712_s26, 4  ;;  %s34_s25 = int_to_ptr.vmem [resolvable:$true] %s33_s25  ;;  %s758_s27 = int_to_ptr.vmem [resolvable:$true] %s21_s27 }
   0x5   :  { %s593_s30 = scalar_lea.hbm %s868_s1, 384 }
   0x6   :  { %p594_p0 = scmp.ne.s32.totalorder %s868_s1, %s593_s30  ;;  %p597_p1 = scmp.lt.u32.totalorder %s593_s30, %s868_s1 }
   0x8   :  { %p599_p2 = pnand %p597_p1, %p594_p0 }
   0xa   :  { %602 = shalt.err (!%p599_p2)
}
   0xb   :  { %s603_s12 = scalar_lea.vmem %s34_s25, 384  ;;  %p608_p4 = scmp.lt.s32.totalorder %s34_s25, %s34_s25 }
   0xc   :  { %p604_p3 = scmp.ne.s32.totalorder %s34_s25, %s603_s12  ;;  %p609_p5 = scmp.lt.s32.totalorder %s603_s12, %s603_s12 }
   0xe   :  { %p610_p6 = por %p609_p5, %p608_p4 }
  0x10   :  { %p611_p7 = pnand %p610_p6, %p604_p3 }
  0x12   :  { %614 = shalt.err (!%p611_p7)
}
  0x13   :  { %s713_s13 = smov 128   ;;  %s714_s14 = smov 8  }
  0x14   :  { %39 = dma.hbm_to_vmem [thread:$0]  %s868_s1, 384, %s34_s25, [#allocation6], %s713_s13, %s713_s13, %s714_s14  }
  0x15   :  { %s615_s19 = scalar_lea.hbm %s867_s0, 256 }
  0x16   :  { %p616_p8 = scmp.ne.s32.totalorder %s867_s0, %s615_s19  ;;  %p619_p9 = scmp.lt.u32.totalorder %s615_s19, %s867_s0 }
  0x18   :  { %p621_p10 = pnand %p619_p9, %p616_p8 }
  0x1a   :  { %624 = shalt.err (!%p621_p10)
}
  0x1b   :  { %s625_s24 = scalar_lea.vmem %s758_s27, 256  ;;  %p630_p12 = scmp.lt.s32.totalorder %s758_s27, %s758_s27 }
  0x1c   :  { %p626_p11 = scmp.ne.s32.totalorder %s758_s27, %s625_s24  ;;  %p631_p13 = scmp.lt.s32.totalorder %s625_s24, %s625_s24 }
  0x1e   :  { %p632_p0 = por %p631_p13, %p630_p12 }
  0x20   :  { %p633_p1 = pnand %p632_p0, %p626_p11 }
  0x22   :  { %636 = shalt.err (!%p633_p1)
}
  0x23   :  { %27 = dma.hbm_to_vmem [thread:$0]  %s867_s0, 256, %s758_s27, [#allocation3], %s713_s13, %s713_s13, %s714_s14  }
  0x24   :  { %s715_s26 = smov [#allocation7]   ;;  %s716_s29 = smov [#allocation8]  }
  0x25   :  { %s47_s28 = sshll.u32 %s715_s26, 4  ;;  %s61_s30 = sshll.u32 %s716_s29, 4  ;;  %s48_s28 = int_to_ptr.vmem [resolvable:$true] %s47_s28  ;;  %s795_s30 = int_to_ptr.vmem [resolvable:$true] %s61_s30 }
  0x26   :  { %s637_s10 = scalar_lea.hbm %s870_s3, 1024 }
  0x27   :  { %p638_p2 = scmp.ne.s32.totalorder %s870_s3, %s637_s10  ;;  %p641_p3 = scmp.lt.u32.totalorder %s637_s10, %s870_s3 }
  0x29   :  { %p643_p4 = pnand %p641_p3, %p638_p2 }
  0x2b   :  { %646 = shalt.err (!%p643_p4)
}
  0x2c   :  { %s647_s0 = scalar_lea.vmem %s48_s28, 1024  ;;  %p652_p6 = scmp.lt.s32.totalorder %s48_s28, %s48_s28 }
  0x2d   :  { %p648_p5 = scmp.ne.s32.totalorder %s48_s28, %s647_s0  ;;  %p653_p7 = scmp.lt.s32.totalorder %s647_s0, %s647_s0 }
  0x2f   :  { %p654_p8 = por %p653_p7, %p652_p6 }
  0x31   :  { %p655_p9 = pnand %p654_p8, %p648_p5 }
  0x33   :  { %658 = shalt.err (!%p655_p9)
}
  0x34   :  { %53 = dma.hbm_to_vmem [thread:$0]  %s870_s3, 1024, %s48_s28, [#allocation6], %s713_s13, %s713_s13, %s714_s14  }
  0x35   :  { %s659_s20 = scalar_lea.hbm %s872_s5, 512 }
  0x36   :  { %p660_p10 = scmp.ne.s32.totalorder %s872_s5, %s659_s20  ;;  %p663_p11 = scmp.lt.u32.totalorder %s659_s20, %s872_s5 }
  0x38   :  { %p665_p12 = pnand %p663_p11, %p660_p10 }
  0x3a   :  { %668 = shalt.err (!%p665_p12)
}
  0x3b   :  { %s669_s1 = scalar_lea.vmem %s795_s30, 512  ;;  %p674_p0 = scmp.lt.s32.totalorder %s795_s30, %s795_s30 }
  0x3c   :  { %p670_p13 = scmp.ne.s32.totalorder %s795_s30, %s669_s1  ;;  %p675_p1 = scmp.lt.s32.totalorder %s669_s1, %s669_s1 }
  0x3e   :  { %p676_p2 = por %p675_p1, %p674_p0 }
  0x40   :  { %p677_p3 = pnand %p676_p2, %p670_p13 }
  0x42   :  { %680 = shalt.err (!%p677_p3)
}
  0x43   :  { %67 = dma.hbm_to_vmem [thread:$0]  %s872_s5, 512, %s795_s30, [#allocation9], %s713_s13, %s713_s13, %s714_s14  }
  0x44   :  { %703 = dma.done.wait [#allocation3], 256  }
  0x45   :  { %704 = vsyncadd [#allocation3], 4294967040 }
  0x46   :  { %705 = dma.done.wait [#allocation6], 1408  }
  0x47   :  { %706 = vsyncadd [#allocation6], 4294965888 }
  0x48   :  { %707 = dma.done.wait [#allocation9], 512  }
  0x49   :  { %708 = vsyncadd [#allocation9], 4294966784  ;;  %vm94_vm0 = vcmask 195584   ;;  %v84_v0 = vld [vmem:[#allocation5] sm:$0xff]  ;;  %v85_v1 = vld [vmem:[#allocation5 + $0x8] sm:$0xff]  ;;  %vm187_vm1 = vcmask 261120  }
  0x4a   :  { %v558_v2 = vpack.c.bf16 %v85_v1, %v84_v0  ;;  %v82_v3 = vld [vmem:[#allocation2] sm:$0xff]  ;;  %v176_v4 = vld [vmem:[#allocation7] sm:$0xff]  ;;  %v177_v6 = vld [vmem:[#allocation7 + $0x8] sm:$0xff]  ;;  %s717_s10 = smov [#allocation10]  }
  0x4b   :  { %v86_v5 = vld [vmem:[#allocation5 + $0x10] sm:$0xff]  ;;  %522 = vmatprep.mubr.msk.f32.mxu0 %vm94_vm0, %v82_v3  ;;  %v562_v7 = vpack.c.bf16 %v177_v6, %v176_v4  ;;  %v83_v8 = vld [vmem:[#allocation2 + $0x8] sm:$0xff]  ;;  %v178_v9 = vld [vmem:[#allocation7 + $0x10] sm:$0xff]  ;;  %s466_s11 = sshll.u32 %s717_s10, 4  ;;  %s467_s11 = int_to_ptr.vmem [resolvable:$true] %s466_s11 }
  0x4c   :  { %559 = vmatprep.subr.bf16.mxu0 %v558_v2  ;;  %v179_v10 = vld [vmem:[#allocation7 + $0x18] sm:$0xff]  ;;  %v272_v12 = vld [vmem:[#allocation7 + $0x20] sm:$0xff]  ;;  %v273_v13 = vld [vmem:[#allocation7 + $0x28] sm:$0xff]  ;;  %p686_p5 = scmp.lt.s32.totalorder %s467_s11, %s467_s11 }
  0x4d   :  { %561 = vmatpush3.bf16.msra.mxu0 %v558_v2  ;;  %563 = vmatprep.subr.bf16.mxu1 %v562_v7  ;;  %v566_v11 = vpack.c.bf16 %v179_v10, %v178_v9  ;;  %v570_v14 = vpack.c.bf16 %v273_v13, %v272_v12  ;;  %v480_v15 = vld [vmem:[%s869_s2] ss:$0 sm:$0xff]  ;;  %v274_v20 = vld [vmem:[#allocation7 + $0x30] sm:$0xff]  ;;  %v367_v23 = vld [vmem:[#allocation8] sm:$0xff] }
  0x4e   :  { %520 = vmatprep.subr.mxu0 %v86_v5  ;;  %565 = vmatpush3.bf16.msra.mxu1 %v562_v7  ;;  %v275_v21 = vld [vmem:[#allocation7 + $0x38] sm:$0xff]  ;;  %v368_v24 = vld [vmem:[#allocation8 + $0x8] sm:$0xff]  ;;  %v369_v33 = vld [vmem:[#allocation8 + $0x10] sm:$0xff] }
  0x4f   :  { %567 = vmatprep.subr.bf16.mxu1 %v566_v11  ;;  %v574_v22 = vpack.c.bf16 %v275_v21, %v274_v20  ;;  %v578_v25 = vpack.c.bf16 %v368_v24, %v367_v23  ;;  %v483_v26 = vld [vmem:[%s871_s4] ss:$0 sm:$0xff]  ;;  %v487_v36 = vld [vmem:[%s871_s4 + $0x1] ss:$0 sm:$0xff]  ;;  %s681_s4 = scalar_lea.vmem %s467_s11, 256 }
  0x50   :  { %v370_v34 = vld [vmem:[#allocation8 + $0x18] sm:$0xff]  ;;  %p682_p4 = scmp.ne.s32.totalorder %s467_s11, %s681_s4  ;;  %p687_p6 = scmp.lt.s32.totalorder %s681_s4, %s681_s4 }
  0x51   :  { %521 = vmatpush3.msra.mxu0 %v86_v5  ;;  %v582_v35 = vpack.c.bf16 %v370_v34, %v369_v33  ;;  %v490_v43 = vld [vmem:[%s873_s6] ss:$0 sm:$0xff] }
  0x52   :  { %523 = vmatmul.mubr.msk.f32.vlgmr.msra.gmra.mrb[0].mxu0 %vm94_vm0, %v83_v8  ;;  %569 = vmatpush3.bf16.msra.mxu1 %v566_v11  ;;  %p688_p7 = por %p687_p6, %p686_p5 }
  0x53   :  { %571 = vmatprep.subr.bf16.mxu0 %v570_v14  ;;  %579 = vmatprep.subr.bf16.mxu1 %v578_v25 }
  0x54   :  { %573 = vmatpush3.bf16.msra.mxu0 %v570_v14  ;;  %p689_p8 = pnand %p688_p7, %p682_p4 }
  0x55   :  { %575 = vmatprep.subr.bf16.mxu0 %v574_v22 }
  0x58   :  { %577 = vmatpush3.bf16.msra.mxu0 %v574_v22 }
 0x125   :  { %v524_v16 = vpop.f32.mrb[0].mxu0 }
 0x126   :  { %v167_v17 = vpop.f32.mrb[1].mxu0  ;;  %v173_v19 = vadd.f32 %v524_v16, %v480_v15 }
 0x127   :  { %v168_v18 = vadd.f32 %v480_v15, %v167_v17 }
 0x129   :  { %533 = vmatprep.mubr.msk.f32.mxu1 %vm187_vm1, %v168_v18 }
 0x12a   :  { %534 = vmatmul.mubr.msk.f32.vlgmr.msra.gmra.mrb[0].mxu1 %vm187_vm1, %v173_v19 }
 0x12b   :  { %581 = vmatpush3.bf16.msra.mxu1 %v578_v25 }
 0x12c   :  { %583 = vmatprep.subr.bf16.mxu1 %v582_v35 }
 0x12f   :  { %585 = vmatpush3.bf16.msra.mxu1 %v582_v35 }
 0x1fd   :  { %v535_v27 = vpop.f32.mrb[0].mxu1 }
 0x1fe   :  { %v266_v28 = vadd.f32 %v535_v27, %v483_v26  ;;  %v260_v29 = vpop.f32.mrb[1].mxu1 }
 0x1ff   :  { %v261_v30 = vadd.f32 %v483_v26, %v260_v29 }
 0x200   :  { %v270_v32 = vmax.f32 %v266_v28, 0.0 }
 0x201   :  { %v269_v31 = vmax.f32 %v261_v30, 0.0 }
 0x203   :  { %544 = vmatprep.mubr.msk.f32.mxu0 %vm187_vm1, %v269_v31 }
 0x204   :  { %545 = vmatmul.mubr.msk.f32.vlgmr.msra.gmra.mrb[2].mxu0 %vm187_vm1, %v270_v32 }
 0x2d7   :  { %v546_v37 = vpop.f32.mrb[2].mxu0 }
 0x2d8   :  { %v362_v38 = vadd.f32 %v546_v37, %v487_v36  ;;  %v356_v39 = vpop.f32.mrb[3].mxu0 }
 0x2d9   :  { %v357_v40 = vadd.f32 %v487_v36, %v356_v39 }
 0x2da   :  { %v366_v42 = vmax.f32 %v362_v38, 0.0 }
 0x2db   :  { %v365_v41 = vmax.f32 %v357_v40, 0.0 }
 0x2dd   :  { %555 = vmatprep.mubr.msk.f32.mxu1 %vm187_vm1, %v365_v41 }
 0x2de   :  { %556 = vmatmul.mubr.msk.f32.vlgmr.msra.gmra.mrb[2].mxu1 %vm187_vm1, %v366_v42 }
 0x3b1   :  { %v557_v44 = vpop.f32.mrb[2].mxu1 }
 0x3b2   :  { %v456_v45 = vadd.f32 %v557_v44, %v490_v43  ;;  %v450_v46 = vpop.f32.mrb[3].mxu1 }
 0x3b3   :  { %v451_v47 = vadd.f32 %v490_v43, %v450_v46 }
 0x3b4   :  { %460 = vst [vmem:[#allocation10 + $0x8] sm:$0xff] %v456_v45 }
 0x3b5   :  { %459 = vst [vmem:[#allocation10] sm:$0xff] %v451_v47 }
 0x3b6   :  { %692 = shalt.err (!%p689_p8)
}
 0x3b7   :  { %s693_s6 = scalar_lea.hbm %s874_s7, 256 }
 0x3b8   :  { %p694_p9 = scmp.ne.s32.totalorder %s874_s7, %s693_s6  ;;  %p697_p10 = scmp.lt.u32.totalorder %s693_s6, %s874_s7 }
 0x3ba   :  { %p699_p11 = pnand %p697_p10, %p694_p9 }
 0x3bc   :  { %702 = shalt.err (!%p699_p11)
}
 0x3bd   :  { %472 = dma.vmem_to_hbm [thread:$0]  %s467_s11, 256, %s874_s7, [#allocation4], %s713_s13, %s713_s13, %s714_s14  }
 0x3be   :  { %709 = dma.done.wait [#allocation4], 256  }
 0x3bf   :  { %710 = vsyncadd [#allocation4], 4294967040 }
 0x3c0   :  { %476 = vsyncpa [#allocation3], 1 }
 0x3c1   :  { %477 = vsyncpa [#allocation6], 1 }
 0x3c2   :  { %478 = vsyncpa [#allocation9], 1 }
 0x3c3   :  { %479 = vsyncpa [#allocation4], 1 }

</bundles_post_ra>
